<compile_context>
chip_gen: v6e
topology: v6e:2x2x1
jax: 0.10.0
libtpu: 0.0.40
codegen_flags: <defaults>
</compile_context>

<pallas_src>
import functools

import jax
import jax.numpy as jnp
from jax import lax
from jax.experimental import pallas as pl
from jax.experimental.pallas import tpu as pltpu

_SUBLANE = 8
_LANE = 128


def _round_up(a, b):
    return (a + b - 1) // b * b


def _cdiv(a, b):
    return (a + b - 1) // b


def _focal_terms(x, t, gamma, alpha):
    """Elementwise focal-loss terms (f32), algebraically matching the PyTorch forward."""
    # sigmoid via EUP tanh: keeps the divide off the (binding) VALU slot.
    probs = 0.5 * jnp.tanh(0.5 * x) + 0.5
    # numerically stable BCE-with-logits (same form F.binary_cross_entropy_with_logits uses)
    ce = jnp.maximum(x, 0.0) - x * t + jnp.log1p(jnp.exp(-jnp.abs(x)))
    # 1 - p_t  ==  t + probs - 2*t*probs
    one_minus_pt = t + probs * (1.0 - 2.0 * t)
    # alpha_t  ==  (2*alpha - 1) * t + (1 - alpha)   (constants folded at trace time)
    alpha_t = (2.0 * float(alpha) - 1.0) * t + (1.0 - float(alpha))
    g = float(gamma)                       # static Python number (as in the nn.Module)
    if g == 2.0:                           # default: one VPU multiply
        mod = one_minus_pt * one_minus_pt
    elif g.is_integer() and g >= 0.0:
        mod = one_minus_pt ** int(g)
    else:                                  # fractional gamma: pow on EUP
        mod = jnp.power(one_minus_pt, g)
    return alpha_t * mod * ce


def _edge_mask(shape, i, j, M, N, block_rows, block_cols, mask_rows, mask_cols):
    valid = None
    if mask_rows:
        r = lax.broadcasted_iota(jnp.int32, shape, 0) + i * block_rows
        valid = r < M
    if mask_cols:
        c = lax.broadcasted_iota(jnp.int32, shape, 1) + j * block_cols
        vc = c < N
        valid = vc if valid is None else jnp.logical_and(valid, vc)
    return valid


def _focal_partial_kernel(logits_ref, targets_ref, part_ref, *, gamma, alpha,
                          M, N, block_rows, block_cols, mask_rows, mask_cols):
    """Each grid block writes an (8,128) slab whose [0,0] entry is the block's partial sum."""
    i = pl.program_id(0)
    j = pl.program_id(1)
    fl = _focal_terms(logits_ref[...].astype(jnp.float32),
                      targets_ref[...].astype(jnp.float32), gamma, alpha)
    if mask_rows or mask_cols:
        valid = _edge_mask(fl.shape, i, j, M, N, block_rows, block_cols,
                           mask_rows, mask_cols)
        fl = jnp.where(valid, fl, 0.0)     # select, so garbage edge reads cannot leak in
    s = jnp.sum(fl)
    rid = lax.broadcasted_iota(jnp.int32, (_SUBLANE, _LANE), 0)
    cid = lax.broadcasted_iota(jnp.int32, (_SUBLANE, _LANE), 1)
    part_ref[0, 0] = jnp.where(jnp.logical_and(rid == 0, cid == 0),
                               s, 0.0).astype(jnp.float32)


def _focal_elementwise_kernel(logits_ref, targets_ref, out_ref, *, gamma, alpha):
    fl = _focal_terms(logits_ref[...].astype(jnp.float32),
                      targets_ref[...].astype(jnp.float32), gamma, alpha)
    out_ref[...] = fl.astype(out_ref.dtype)   # OOB parts of ragged edge blocks are dropped


def _choose_blocks(M, N, target_block_elems):
    # Column tiling: take the full width when it fits the budget with >= 8 rows,
    # otherwise tile N in lane-aligned (multiple-of-128) chunks.
    if N * _SUBLANE <= target_block_elems or N <= _LANE:
        block_cols = N                                  # full dim (allowed even if not %128)
    else:
        block_cols = max(_LANE, (target_block_elems // _SUBLANE) // _LANE * _LANE)
        block_cols = min(block_cols, _round_up(N, _LANE))
    grid_n = _cdiv(N, block_cols)

    if M < _SUBLANE:
        block_rows = M                                  # full (unaligned) dim is allowed
    else:
        block_rows = max(_SUBLANE,
                         (target_block_elems // block_cols) // _SUBLANE * _SUBLANE)
        block_rows = min(block_rows, _round_up(M, _SUBLANE))
        if grid_n == 1:
            # Keep >= ~4 row blocks when M allows so the "parallel" grid feeds both
            # TensorCores on v7x instead of collapsing to a single grid step.
            cap = _round_up(_cdiv(M, 4), _SUBLANE)
            block_rows = max(_SUBLANE, min(block_rows, cap))
    grid_m = _cdiv(M, block_rows)
    return block_rows, block_cols, grid_m, grid_n


def multilabel_focal_loss_with_logits(logits, targets, gamma=2.0, alpha=0.25,
                                      reduction="mean", target_block_bytes=2 << 20):
    """Pallas TPU implementation of MultiLabelFocalLossWithLogits.forward."""
    assert logits.shape == targets.shape
    orig_shape = logits.shape
    if logits.ndim != 2:
        last = orig_shape[-1] if logits.ndim >= 1 else 1
        logits = logits.reshape(-1, last)
        targets = targets.reshape(-1, last)
    M, N = logits.shape

    # Budget is expressed in f32 working-set bytes per stream (independent of input dtype).
    target_block_elems = max(_SUBLANE * _LANE, target_block_bytes // 4)
    block_rows, block_cols, grid_m, grid_n = _choose_blocks(M, N, target_block_elems)
    mask_rows = (M % block_rows) != 0
    mask_cols = (N % block_cols) != 0

    tile_spec = pl.BlockSpec((block_rows, block_cols), lambda i, j: (i, j))
    cparams = pltpu.CompilerParams(
        dimension_semantics=("parallel", "parallel"),
        vmem_limit_bytes=40 * 1024 * 1024,     # safe headroom on v7x's 64 MiB physical VMEM
    )

    if reduction in ("mean", "sum"):
        partials = pl.pallas_call(
            functools.partial(_focal_partial_kernel, gamma=gamma, alpha=alpha,
                              M=M, N=N, block_rows=block_rows, block_cols=block_cols,
                              mask_rows=mask_rows, mask_cols=mask_cols),
            out_shape=jax.ShapeDtypeStruct((grid_m, grid_n, _SUBLANE, _LANE), jnp.float32),
            grid=(grid_m, grid_n),
            in_specs=[tile_spec, tile_spec],
            out_specs=pl.BlockSpec((1, 1, _SUBLANE, _LANE), lambda i, j: (i, j, 0, 0)),
            compiler_params=cparams,
        )(logits, targets)
        total = jnp.sum(partials)              # tiny final reduce over per-block partials
        if reduction == "mean":
            total = total / jnp.float32(M * N)
        return total.astype(logits.dtype)

    # reduction == 'none' (or anything else, mirroring the PyTorch module's fallthrough)
    out = pl.pallas_call(
        functools.partial(_focal_elementwise_kernel, gamma=gamma, alpha=alpha),
        out_shape=jax.ShapeDtypeStruct((M, N), logits.dtype),
        grid=(grid_m, grid_n),
        in_specs=[tile_spec, tile_spec],
        out_specs=tile_spec,
        compiler_params=cparams,
    )(logits, targets)
    return out.reshape(orig_shape)


def _reference(logits, targets, gamma=2.0, alpha=0.25, reduction="mean"):
    """Pure-JAX mirror of the PyTorch forward."""
    x = logits.astype(jnp.float32)
    t = targets.astype(jnp.float32)
    probs = jax.nn.sigmoid(x)
    ce = jnp.maximum(x, 0.0) - x * t + jnp.log1p(jnp.exp(-jnp.abs(x)))
    p_t = probs * t + (1.0 - probs) * (1.0 - t)
    alpha_t = alpha * t + (1.0 - alpha) * (1.0 - t)
    fl = alpha_t * (1.0 - p_t) ** gamma * ce
    if reduction == "mean":
        return fl.mean()
    if reduction == "sum":
        return fl.sum()
    return fl


if __name__ == "__main__":
    key = jax.random.PRNGKey(0)
    ok = True

    # One tile-aligned case and one ragged case exercising the in-kernel edge masking.
    for shape in [(16, 128), (13, 200)]:
        k1, k2, key = jax.random.split(key, 3)
        logits = jax.random.normal(k1, shape, dtype=jnp.float32) * 2.0
        targets = jax.random.bernoulli(k2, p=0.3, shape=shape).astype(jnp.float32)

        for red in ("mean", "sum", "none"):
            out = jax.block_until_ready(
                multilabel_focal_loss_with_logits(logits, targets, reduction=red))
            ref = _reference(logits, targets, reduction=red)
            if not jnp.allclose(out, ref, rtol=1e-4, atol=1e-5):
                ok = False
                print("MISMATCH", shape, red)

    if ok:
        print("KERNEL_OK")
</pallas_src>

<mosaic_0001>
module attributes {stable_mosaic.version = 11 : i64} {
  func.func @_focal_partial_kernel(%arg0: i32, %arg1: i32, %arg2: memref<8x128xf32, #tpu.memory_space<vmem>>, %arg3: memref<8x128xf32, #tpu.memory_space<vmem>>, %arg4: memref<1x1x8x128xf32, #tpu.memory_space<vmem>>) attributes {dimension_semantics = [#tpu.dimension_semantics<parallel>, #tpu.dimension_semantics<parallel>], iteration_bounds = array<i64: 2, 1>, scalar_prefetch = 0 : i64, scratch_operands = 0 : i64, tpu.core_type = #tpu.core_type<tc>, window_params = [{transform_indices = @transform_0, window_bounds = array<i64: 8, 128>}, {transform_indices = @transform_1, window_bounds = array<i64: 8, 128>}, {transform_indices = @transform_2, window_bounds = array<i64: 1, 1, 8, 128>}]} {
    %c0 = arith.constant 0 : index
    %c0_0 = arith.constant 0 : index
    %0 = vector.load %arg2[%c0, %c0_0] : memref<8x128xf32, #tpu.memory_space<vmem>>, vector<8x128xf32>
    %c0_1 = arith.constant 0 : index
    %c0_2 = arith.constant 0 : index
    %1 = vector.load %arg3[%c0_1, %c0_2] : memref<8x128xf32, #tpu.memory_space<vmem>>, vector<8x128xf32>
    %cst = arith.constant 5.000000e-01 : f32
    %2 = vector.broadcast %cst : f32 to vector<8x128xf32>
    %3 = arith.mulf %2, %0 : vector<8x128xf32>
    %4 = math.tanh %3 : vector<8x128xf32>
    %cst_3 = arith.constant 5.000000e-01 : f32
    %5 = vector.broadcast %cst_3 : f32 to vector<8x128xf32>
    %6 = arith.mulf %5, %4 : vector<8x128xf32>
    %cst_4 = arith.constant 5.000000e-01 : f32
    %7 = vector.broadcast %cst_4 : f32 to vector<8x128xf32>
    %8 = arith.addf %6, %7 : vector<8x128xf32>
    %cst_5 = arith.constant 0.000000e+00 : f32
    %9 = vector.broadcast %cst_5 : f32 to vector<8x128xf32>
    %10 = arith.maximumf %0, %9 : vector<8x128xf32>
    %11 = arith.mulf %0, %1 : vector<8x128xf32>
    %12 = arith.subf %10, %11 : vector<8x128xf32>
    %13 = math.absf %0 : vector<8x128xf32>
    %cst_6 = arith.constant 0.000000e+00 : f32
    %14 = vector.broadcast %cst_6 : f32 to vector<8x128xf32>
    %15 = arith.subf %14, %13 : vector<8x128xf32>
    %16 = math.exp %15 : vector<8x128xf32>
    %17 = math.log1p %16 : vector<8x128xf32>
    %18 = arith.addf %12, %17 : vector<8x128xf32>
    %cst_7 = arith.constant 2.000000e+00 : f32
    %19 = vector.broadcast %cst_7 : f32 to vector<8x128xf32>
    %20 = arith.mulf %19, %1 : vector<8x128xf32>
    %cst_8 = arith.constant 1.000000e+00 : f32
    %21 = vector.broadcast %cst_8 : f32 to vector<8x128xf32>
    %22 = arith.subf %21, %20 : vector<8x128xf32>
    %23 = arith.mulf %8, %22 : vector<8x128xf32>
    %24 = arith.addf %1, %23 : vector<8x128xf32>
    %cst_9 = arith.constant -5.000000e-01 : f32
    %25 = vector.broadcast %cst_9 : f32 to vector<8x128xf32>
    %26 = arith.mulf %25, %1 : vector<8x128xf32>
    %cst_10 = arith.constant 7.500000e-01 : f32
    %27 = vector.broadcast %cst_10 : f32 to vector<8x128xf32>
    %28 = arith.addf %26, %27 : vector<8x128xf32>
    %29 = arith.mulf %24, %24 : vector<8x128xf32>
    %30 = arith.mulf %28, %29 : vector<8x128xf32>
    %31 = arith.mulf %30, %18 : vector<8x128xf32>
    %32 = vector.shape_cast %31 : vector<8x128xf32> to vector<1x8x128xf32>
    %cst_11 = arith.constant dense<0.000000e+00> : vector<1xf32>
    %33 = vector.multi_reduction <add>, %32, %cst_11 [1, 2] : vector<1x8x128xf32> to vector<1xf32>
    %34 = vector.shape_cast %33 : vector<1xf32> to vector<1x1x1xf32>
    %35 = vector.extract %34[0, 0, 0] : f32 from vector<1x1x1xf32>
    %36 = tpu.iota {dimensions = array<i32: 0>} : vector<8x128xi32>
    %37 = tpu.iota {dimensions = array<i32: 1>} : vector<8x128xi32>
    %c0_i32 = arith.constant 0 : i32
    %38 = vector.broadcast %c0_i32 : i32 to vector<8x128xi32>
    %39 = arith.cmpi eq, %36, %38 : vector<8x128xi32>
    %c0_i32_12 = arith.constant 0 : i32
    %40 = vector.broadcast %c0_i32_12 : i32 to vector<8x128xi32>
    %41 = arith.cmpi eq, %37, %40 : vector<8x128xi32>
    %42 = arith.andi %39, %41 : vector<8x128xi1>
    %cst_13 = arith.constant 0.000000e+00 : f32
    %43 = vector.broadcast %35 : f32 to vector<8x128xf32>
    %44 = vector.broadcast %cst_13 : f32 to vector<8x128xf32>
    %45 = arith.select %42, %43, %44 : vector<8x128xi1>, vector<8x128xf32>
    %c0_14 = arith.constant 0 : index
    %c0_15 = arith.constant 0 : index
    %c0_16 = arith.constant 0 : index
    %c0_17 = arith.constant 0 : index
    %46 = vector.load %arg4[%c0_14, %c0_15, %c0_16, %c0_17] : memref<1x1x8x128xf32, #tpu.memory_space<vmem>>, vector<1x1x8x128xf32>
    %47 = vector.shape_cast %46 : vector<1x1x8x128xf32> to vector<8x128xf32>
    %48 = vector.shape_cast %45 : vector<8x128xf32> to vector<1x1x8x128xf32>
    tpu.vector_store %arg4[%c0_14, %c0_15, %c0_16, %c0_17], %48 {strides = array<i32>} : memref<1x1x8x128xf32, #tpu.memory_space<vmem>>, vector<1x1x8x128xf32>,
    return
  }
  func.func @transform_0(%arg0: i32, %arg1: i32) -> (i32, i32) {
    %c0_i32 = arith.constant 0 : i32
    return %arg0, %arg1 : i32, i32
  }
  func.func @transform_1(%arg0: i32, %arg1: i32) -> (i32, i32) {
    %c0_i32 = arith.constant 0 : i32
    return %arg0, %arg1 : i32, i32
  }
  func.func @transform_2(%arg0: i32, %arg1: i32) -> (i32, i32, i32, i32) {
    %c0_i32 = arith.constant 0 : i32
    %c0_i32_0 = arith.constant 0 : i32
    %c0_i32_1 = arith.constant 0 : i32
    return %arg0, %arg1, %c0_i32, %c0_i32_0 : i32, i32, i32, i32
  }
}

</mosaic_0001>

<bundles_post_ra>
// kernel: tpu_custom_call.1
= control target key start
LH: loop header
LB: loop body
LE: loop exit
PB: predicated region body
PF: predicated region fallthrough
CT: control target
= control target key end

     0   :  { %7 = vsyncpa [#allocation3], 0  ;;  %s809_s0 = inlined_call_operand.hbm [shape: f32[16,128], index: 0, kind: input, shape index: {}]   ;;  %s810_s1 = inlined_call_operand.hbm [shape: f32[16,128], index: 1, kind: input, shape index: {}]   ;;  %s811_s2 = inlined_call_operand.hbm [shape: f32[2,1,8,128], index: 2, kind: output, shape index: {}]  }
   0x1   :  { %9 = vsyncpa [#allocation3 + $0x1], 0 }
   0x2   :  { %10 = vsyncpa [#allocation6], 0 }
   0x3   :  { %12 = vsyncpa [#allocation6 + $0x1], 0 }
   0x4   :  { %13 = vsyncpa [#allocation4], 0 }
   0x5   :  { %15 = vsyncpa [#allocation4 + $0x1], 0  ;;  %s637_s9 = smov 0   ;;  %s639_s10 = smov 0  }
   0x6   :  { %s641_s11 = smov 0   ;;  %s643_s12 = smov 0  }
   0x7   :  { %s645_s13 = smov 0   ;;  %s647_s14 = smov 0  }
   0x8 LB: > { %s386_s15 = sadd.s32 4294967295, %s617_s14   ;;  %s387_s16 = sadd.s32 4294967294, %s617_s14   ;;  %s617_s14 = sphi %s647_s14, %s21_s14   ;;  %s613_s13 = sphi %s645_s13, %s823_s13   ;;  %s609_s12 = sphi %s643_s12, %s822_s12   ;;  %s605_s11 = sphi %s641_s11, %s821_s11   ;;  %s601_s10 = sphi %s639_s10, %s820_s10   ;;  %s597_s9 = sphi %s637_s9, %s819_s9  }
   0x9   : > { %s33_s17 = sadd.s32 1, %s613_s13  ;;  %s42_s18 = sadd.s32 1, %s605_s11 }
   0xa   : > { %p35_p0 = scmp.ge.s32.totalorder %s33_s17, 2  ;;  %p49_p1 = scmp.ne.s32.totalorder %s605_s11, %s601_s10 }
   0xb   : > { %p50_p2 = scmp.eq.s32.totalorder %s617_s14, 0  ;;  %p55_p3 = scmp.ne.s32.totalorder %s601_s10, %s597_s9 }
   0xc   : > { %s825_s17 = smov (%p35_p0, %s33_s17), 0  ;;  %p56_p5 = scmp.eq.s32.totalorder %s386_s15, 0 }
   0xd   : > { %p678_p4 = por %p50_p2, %p49_p1  ;;  %s37_s20 = ssub.s32 %s613_s13, %s825_s17 }
   0xe   : > { %p109_p6 = scmp.eq.s32.totalorder %s386_s15, 1  ;;  %p40_p7 = scmp.eq.s32.totalorder %s37_s20, 0 }
   0xf   : > { %p684_p8 = por %p56_p5, %p55_p3  ;;  %p115_p10 = scmp.eq.s32.totalorder %s387_s16, 1 }
  0x10   : > { %p688_p9 = por %p109_p6, %p49_p1  ;;  %p421_p13 = scmp.lt.s32.totalorder %s617_s14, 2 }
  0x11   : > { %s693_s23 = scalar_select %p40_p7, %s605_s11, %s42_s18  }
  0x12   : > { %p695_p11 = por %p115_p10, %p55_p3  ;;  %s702_s25 = sand.u32 1, %s605_s11  }
  0x13   : > { %s390_s26 = sshll.u32 %s702_s25, 3  ;;  %s391_s27 = sshll.u32 %s613_s13, 7 }
  0x14   : > { %s145_s30 = scalar_lea.hbm %s809_s0, %s391_s27  ;;  %s139_s3 = scalar_lea.vmem [#allocation2], %s390_s26 }
  0x15   : > { %s147_s4 = sshll.u32 %s139_s3, 4  ;;  %p711_p0 = pnand %p421_p13, %p678_p4  ;;  %s148_s4 = int_to_ptr.vmem [resolvable:$true] %s147_s4 }
  0x16   : > { %p394_p1 = scmp.ge.s32.totalorder %s617_s14, 1  ;;  %p171_p2 = scmp.lt.s32.totalorder %s617_s14, 3 }
  0x17   : > { %s136_s6 = scalar_lea.sflag [#allocation3], %s702_s25  ;;  %p479_p3 = pneg %p711_p0 }
  0x18   : > { %s490_s7 = scalar_lea.vmem %s148_s4, 128  ;;  %s619_s8 = smov [#allocation2]  }
  0x19   : > { %p491_p5 = scmp.ne.s32.totalorder %s148_s4, %s490_s7  ;;  %s495_s15 = sshll.u32 %s619_s8, 4  ;;  %s496_s15 = int_to_ptr.vmem [resolvable:$false] %s495_s15 }
  0x1a   : > { %s497_s16 = scalar_lea.vmem %s496_s15, 256  ;;  %p498_p4 = scmp.lt.s32.totalorder %s148_s4, %s496_s15 }
  0x1b   : > { %p493_p6 = pnand %p491_p5, %p479_p3  ;;  %p499_p10 = scmp.lt.s32.totalorder %s497_s16, %s490_s7 }
  0x1d   : > { %p494_p7 = pneg %p493_p6  ;;  %p500_p13 = por %p499_p10, %p498_p4 }
  0x1f   : > { %p501_p12 = pnand %p500_p13, %p494_p7 }
  0x21   : > { %504 = shalt.err (!%p501_p12)
}
  0x22   : > { %413 = dma.hbm_to_vmem [thread:$0]  (!%p711_p0), %s145_s30, 128, %s148_s4, %s136_s6  }
  0x23   : > { %p729_p5 = pnand %p394_p1, %p171_p2  ;;  %s164_s28 = scalar_lea.hbm %s810_s1, %s391_s27 }
  0x24   : > { %s158_s29 = scalar_lea.vmem [#allocation5], %s390_s26  ;;  %s155_s7 = scalar_lea.sflag [#allocation6], %s702_s25 }
  0x25   : > { %s166_s3 = sshll.u32 %s158_s29, 4  ;;  %s620_s30 = smov [#allocation5]   ;;  %s167_s3 = int_to_ptr.vmem [resolvable:$true] %s166_s3 }
  0x26   : > { %s518_s8 = scalar_lea.vmem %s167_s3, 128  ;;  %s523_s4 = sshll.u32 %s620_s30, 4  ;;  %s524_s4 = int_to_ptr.vmem [resolvable:$false] %s523_s4 }
  0x27   : > { %p519_p12 = scmp.ne.s32.totalorder %s167_s3, %s518_s8  ;;  %s525_s6 = scalar_lea.vmem %s524_s4, 256 }
  0x28   : > { %p526_p1 = scmp.lt.s32.totalorder %s167_s3, %s524_s4  ;;  %p527_p2 = scmp.lt.s32.totalorder %s525_s6, %s518_s8 }
  0x29   : > { %p521_p6 = pnand %p519_p12, %p479_p3 }
  0x2a   : > { %p528_p4 = por %p527_p2, %p526_p1 }
  0x2b   : > { %p522_p7 = pneg %p521_p6 }
  0x2d   : > { %p529_p10 = pnand %p528_p4, %p522_p7 }
  0x2f   : > { %532 = shalt.err (!%p529_p10)
}
  0x30   : > { %416 = dma.hbm_to_vmem [thread:$0]  (!%p711_p0), %s164_s28, 128, %s167_s3, %s155_s7  }
  0x31   : > { %175 = sbr.rel (%p729_p5) target bundleno = 316 (0x13c), region = 28  ;;  %s745_s25 = sand.u32 (!%p729_p5), 1, %s601_s10  }
  0x32   : > { %s748_s26 = sshll.u32 (!%p729_p5), %s745_s25, 3  ;;  %s178_s27 = scalar_lea.sflag (!%p729_p5), [#allocation3], %s745_s25 }
  0x33   : > { %s181_s15 = scalar_lea.vmem (!%p729_p5), [#allocation2], %s748_s26 }
  0x36   : > { %584 = dma.done.wait (%p684_p8), %s178_s27, 128  }
  0x37   : > { %586 = vsyncadd (%p684_p8), %s178_s27, 4294967168  ;;  %s187_s5 = scalar_lea.sflag [#allocation6], %s745_s25  ;;  %s190_s16 = scalar_lea.vmem [#allocation5], %s748_s26 }
  0x38   : > { %588 = dma.done.wait (%p684_p8), %s187_s5, 128  }
  0x39   : > { %590 = vsyncadd (%p684_p8), %s187_s5, 4294967168  ;;  %v216_v0 = vld [vmem:[%s181_s15] sm:$0xff]  ;;  %v217_v5 = vld [vmem:[%s190_s16] sm:$0xff]  ;;  %v257_v38 = vlaneseq  ;;  %s399_s21 = sshll.u32 %s609_s12, 7  ;;  %s215_s18 = scalar_lea.vmem [#allocation7], %s748_s26 }
  0x3a   : > { %v218_v1 = vmul.f32 0.5, %v216_v0  ;;  %v225_v2 = vand.u32 2147483647, %v216_v0  ;;  %v239_v8 = vmul.f32 2.0, %v217_v5  ;;  %v243_v16 = vmul.f32 -0.5, %v217_v5  ;;  %s282_s19 = sshll.u32 %s215_s18, 4  ;;  %s767_s3 = scalar_lea.hbm %s811_s2, %s399_s21  ;;  %s283_s19 = int_to_ptr.vmem [resolvable:$true] %s282_s19 }
  0x3b   : > { %v222_v18 = vmax.f32 %v216_v0, 0.0  ;;  %v223_v19 = vmul.f32 %v217_v5, %v216_v0  ;;  %v258_v39 = vshrl.u32 %v257_v38, 7  ;;  %v260_v40 = vand.u32 127, %v257_v38  ;;  %s268_s7 = scalar_lea.sflag [#allocation4], %s745_s25  ;;  %s533_s8 = scalar_lea.vmem %s283_s19, 128 }
  0x3c   : > { %471 = vtanh.f32 %v218_v1  ;;  %v226_v3 = vsub.f32 0.0, %v225_v2  ;;  %v240_v12 = vsub.f32 1.0, %v239_v8  ;;  %v244_v21 = vadd.f32 0.75, %v243_v16  ;;  %p534_p8 = scmp.ne.s32.totalorder %s283_s19, %s533_s8  ;;  %s621_s12 = smov [#allocation7]  }
  0x3d   : > { %v224_v25 = vsub.f32 %v222_v18, %v223_v19  ;;  %vm261_vm1 = vcmp.eq.s32.totalorder %v258_v39, 0  ;;  %vm262_vm2 = vcmp.eq.s32.totalorder %v260_v40, 0  ;;  %s537_s30 = sshll.u32 %s621_s12, 4  ;;  %s538_s30 = int_to_ptr.vmem [resolvable:$false] %s537_s30 }
  0x3e   : > { %v227_v4 = vmul.f32 1.442695, %v226_v3  ;;  %vm263_vm3 = vmand %vm261_vm1, %vm262_vm2  ;;  %p535_p0 = pnand %p534_p8, %p688_p9  ;;  %s539_s4 = scalar_lea.vmem %s538_s30, 256 }
  0x3f   : > { %p540_p13 = scmp.lt.s32.totalorder %s283_s19, %s538_s30  ;;  %p541_p5 = scmp.lt.s32.totalorder %s539_s4, %s533_s8 }
  0x40   : > { %473 = vpow2.f32 %v227_v4  ;;  %p536_p3 = pneg %p535_p0 }
  0x41   : > { %p542_p12 = por %p541_p5, %p540_p13 }
  0x43   : > { %p543_p6 = pnand %p542_p12, %p536_p3 }
  0x49   : > { %v472_v6 = vpop.eup %471 }
  0x4a   : > { %v220_v7 = vmul.f32 0.5, %v472_v6 }
  0x4c   : > { %v221_v11 = vadd.f32 0.5, %v220_v7 }
  0x4d   : > { %v474_v9 = vpop.eup %473 }
  0x4e   : > { %v229_v10 = vadd.f32 1.0, %v474_v9  ;;  %v241_v13 = vmul.f32 %v240_v12, %v221_v11  ;;  %v232_v14 = vmul.f32 -0.5, %v474_v9  ;;  %v235_v20 = vand.u32 2147483647, %v474_v9 }
  0x50   : > { %475 = vlog2.f32 %v229_v10  ;;  %v242_v15 = vadd.f32 %v241_v13, %v217_v5  ;;  %v233_v17 = vadd.f32 1.0, %v232_v14  ;;  %vm236_vm0 = vcmp.lt.f32.partialorder %v235_v20, 0.0004427343 }
  0x52   : > { %v245_v22 = vmul.f32 %v242_v15, %v242_v15  ;;  %v234_v23 = vmul.f32 %v474_v9, %v233_v17 }
  0x54   : > { %v246_v27 = vmul.f32 %v245_v22, %v244_v21 }
  0x5d   : > { %v476_v24 = vpop.eup %475 }
  0x5e   : > { %v231_v26 = vmul.f32 0.6931472, %v476_v24 }
  0x60   : > { %v237_v28 = vsel %vm236_vm0, %v234_v23, %v231_v26 }
  0x61   : > { %v238_v29 = vadd.f32 %v237_v28, %v224_v25 }
  0x63   : > { %v247_v30 = vmul.f32 %v246_v27, %v238_v29 }
  0x65   : > { %248 = vadd.xlane.f32.xlu0 %v247_v30 }
  0xee   : > { %v249_v31 = vpop.xlane.xlu0 %248 }
  0xef   : > { %v250_v32 = vrot.slane %v249_v31, 4 }
  0xf1   : > { %v251_v33 = vadd.f32 %v250_v32, %v249_v31 }
  0xf3   : > { %v252_v34 = vrot.slane %v251_v33, 2 }
  0xf5   : > { %v253_v35 = vadd.f32 %v252_v34, %v251_v33 }
  0xf7   : > { %v254_v36 = vrot.slane %v253_v35, 1 }
  0xf9   : > { %v255_v37 = vadd.f32 %v254_v36, %v253_v35 }
  0xfb   : > { %402 = vpush %v255_v37 }
 0x12c   : > { %s403_s20 = spop %402 }
 0x12d   : > { %v264_v41 = vstv %s403_s20 }
 0x12e   : > { %v265_v42 = vsel %vm263_vm3, %v264_v41, 0.0 }
 0x12f   : > { %266 = vst [vmem:[%s215_s18] sm:$0xff] %v265_v42 }
 0x130   : > { %546 = shalt.err (!%p543_p6)
}
 0x131   : > { %s547_s6 = scalar_lea.hbm %s767_s3, 128  ;;  %s551_s27 = scalar_lea.hbm %s811_s2, 256 }
 0x132   : > { %p548_p7 = scmp.ne.s32.totalorder %s767_s3, %s547_s6  ;;  %p552_p4 = scmp.lt.s32.totalorder %s767_s3, %s811_s2 }
 0x133   : > { %p553_p10 = scmp.lt.s32.totalorder %s551_s27, %s547_s6 }
 0x134   : > { %p549_p1 = pnand %p548_p7, %p688_p9 }
 0x135   : > { %p554_p8 = por %p553_p10, %p552_p4 }
 0x136   : > { %p550_p2 = pneg %p549_p1 }
 0x138   : > { %p555_p0 = pnand %p554_p8, %p550_p2 }
 0x13a   : > { %558 = shalt.err (!%p555_p0)
}
 0x13b   : > { %408 = dma.vmem_to_hbm [thread:$0]  (%p688_p9), %s283_s19, 128, %s767_s3, %s268_s7  }
 0x13c PF: > { %s294_s16 = sand.u32 1, %s597_s9   ;;  %p818_p3 = scmp.ge.s32.totalorder %s617_s14, 2 }
 0x13d   : > { %s295_s21 = scalar_lea.sflag [#allocation4], %s294_s16 }
 0x13e   : > { %p418_p13 = pnand %p818_p3, %p695_p11 }
 0x140   : > { %p419_p5 = pneg %p418_p13 }
 0x142   : > { %592 = dma.done.wait (%p419_p5), %s295_s21, 128  }
 0x143   : > { %594 = vsyncadd (%p419_p5), %s295_s21, 4294967168  ;;  %s21_s14 = sadd.s32 1, %s617_s14   ;;  %s819_s9 = smov %s601_s10 }
 0x144   : > { %p18_p12 = scmp.ge.s32.totalorder %s21_s14, 4   ;;  %s820_s10 = smov %s605_s11 }
 0x145   : > { %s821_s11 = smov %s693_s23  ;;  %s822_s12 = smov %s613_s13 }
 0x146   : > { %s823_s13 = smov %s825_s17  ;;  %20 = sbr.rel (!%p18_p12) target bundleno = 8 (0x8), region = 86 }
 0x14b   :  { %300 = vsyncpa [#allocation3], 1 }
 0x14c   :  { %302 = vsyncpa [#allocation3 + $0x1], 1 }
 0x14d   :  { %303 = vsyncpa [#allocation6], 1 }
 0x14e   :  { %305 = vsyncpa [#allocation6 + $0x1], 1 }
 0x14f   :  { %306 = vsyncpa [#allocation4], 1 }
 0x150   :  { %308 = vsyncpa [#allocation4 + $0x1], 1 }

</bundles_post_ra>
